<compile_context>
chip_gen: v5e
topology: v5e:2x2
jax: 0.10.0
libtpu: 0.0.40
codegen_flags: <defaults>
</compile_context>

<pallas_src>
import math
import itertools
import numpy as np
import jax
import jax.numpy as jnp
from jax.experimental import pallas as pl
from jax.experimental.pallas import tpu as pltpu

CE_COEFF = 1.0
L1_COEFF = 5.0
GIOU_COEFF = 2.0
EPS = 1e-7
LANE = 128


# ----------------------------- kernel helpers ------------------------------
def _cxcywh_to_xyxy(cx, cy, w, h):
    return cx - 0.5 * w, cy - 0.5 * h, cx + 0.5 * w, cy + 0.5 * h


def _recip_approx(x):
    # EUP slot, otherwise idle in these elementwise-dominated kernels.
    return pl.reciprocal(x, approx=True)


def _recip_refined(x):
    # approx reciprocal + one Newton step: near-exact, still off the div path.
    r = pl.reciprocal(x, approx=True)
    return r * (2.0 - x * r)


def _giou(ox0, oy0, ox1, oy1, tx0, ty0, tx1, ty1, recip):
    # broadcasting: pairwise (N,1) x (1,Tp) in the cost kernel, elementwise
    # (1,Kp) rows in the loss kernel.
    ix0 = jnp.maximum(ox0, tx0)
    iy0 = jnp.maximum(oy0, ty0)
    ix1 = jnp.minimum(ox1, tx1)
    iy1 = jnp.minimum(oy1, ty1)
    inter = jnp.maximum(ix1 - ix0, 0.0) * jnp.maximum(iy1 - iy0, 0.0)
    area_o = (ox1 - ox0) * (oy1 - oy0)
    area_t = (tx1 - tx0) * (ty1 - ty0)
    union = area_o + area_t - inter
    iou = inter * recip(union + EPS)
    ex0 = jnp.minimum(ox0, tx0)
    ey0 = jnp.minimum(oy0, ty0)
    ex1 = jnp.maximum(ox1, tx1)
    ey1 = jnp.maximum(oy1, ty1)
    enc = (ex1 - ex0) * (ey1 - ey0)
    return iou - (enc - union) * recip(enc + EPS)


# ------------------------------ Pallas kernels ------------------------------
def cost_kernel(logits_ref, onehot_ref, obox_ref, tboxT_ref, cost_ref, logp_ref):
    """Per-batch HungarianMatcher cost block + log-softmax side output."""
    logits = logits_ref[...]                                   # (N, C) f32
    m = jnp.max(logits, axis=-1, keepdims=True)
    e = jnp.exp(logits - m)
    s = jnp.sum(e, axis=-1, keepdims=True)
    logp_ref[...] = (logits - m) - jnp.log(s)                  # reused by loss
    prob = e * _recip_approx(s)                                # softmax

    # class cost = -prob[:, tgt_ids]  ==  -prob @ one_hot(tgt_ids)  (bf16 MXU)
    class_cost = -jnp.dot(prob.astype(jnp.bfloat16), onehot_ref[...],
                          preferred_element_type=jnp.float32)  # (N, Tp)

    ob = obox_ref[...]                                         # (N, 4) cxcywh
    tb = tboxT_ref[...]                                        # (4, Tp) cxcywh
    ocx, ocy, ow, oh = ob[:, 0:1], ob[:, 1:2], ob[:, 2:3], ob[:, 3:4]   # (N,1)
    tcx, tcy, tw, th = tb[0:1, :], tb[1:2, :], tb[2:3, :], tb[3:4, :]   # (1,Tp)
    ox0, oy0, ox1, oy1 = _cxcywh_to_xyxy(ocx, ocy, ow, oh)
    tx0, ty0, tx1, ty1 = _cxcywh_to_xyxy(tcx, tcy, tw, th)
    bbox_cost = -_giou(ox0, oy0, ox1, oy1, tx0, ty0, tx1, ty1,
                       _recip_approx)                          # (N, Tp)

    l1_cost = (jnp.abs(ocx - tcx) + jnp.abs(ocy - tcy) +
               jnp.abs(ow - tw) + jnp.abs(oh - th))            # p=1 cdist

    cost_ref[...] = class_cost + bbox_cost + l1_cost


def loss_kernel(logp_ref, tgt_cls_ref, ce_w_ref, pack_ref, out_ref):
    """Weighted CE + masked L1 + masked diagonal GIoU, fused (1,128) output."""
    # ---- weighted cross entropy (F.cross_entropy with class weights) -------
    logp = logp_ref[...]                                       # (M, C)
    cls_iota = jax.lax.broadcasted_iota(jnp.int32, logp.shape, 1)
    onehot = (cls_iota == tgt_cls_ref[...]).astype(jnp.float32)  # (M, C)
    nll = -jnp.sum(onehot * logp, axis=-1, keepdims=True)        # (M, 1)
    w = jnp.sum(onehot * ce_w_ref[...], axis=-1, keepdims=True)  # (M, 1)
    num = jnp.sum(w * nll, keepdims=True)                        # (1, 1)
    den = jnp.sum(w, keepdims=True)                              # (1, 1)
    ce = num * _recip_refined(den) * CE_COEFF                    # (1, 1)

    # ---- box losses over matched (and object-masked) pairs -----------------
    pack = pack_ref[...]                                       # (16, Kp) coord-major
    scx, scy, sw, sh = pack[0:1, :], pack[1:2, :], pack[2:3, :], pack[3:4, :]
    tcx, tcy, tw, th = pack[4:5, :], pack[5:6, :], pack[6:7, :], pack[7:8, :]
    mask = pack[8:9, :]                                        # (1, Kp) {0,1}
    num_boxes = jnp.sum(mask, keepdims=True) + 1e-6            # (1, 1)
    inv_nb = _recip_refined(num_boxes)

    l1_per = (jnp.abs(scx - tcx) + jnp.abs(scy - tcy) +
              jnp.abs(sw - tw) + jnp.abs(sh - th))             # (1, Kp)
    l1 = jnp.sum(mask * l1_per, keepdims=True) * inv_nb * L1_COEFF

    sx0, sy0, sx1, sy1 = _cxcywh_to_xyxy(scx, scy, sw, sh)
    tx0, ty0, tx1, ty1 = _cxcywh_to_xyxy(tcx, tcy, tw, th)
    giou_d = _giou(sx0, sy0, sx1, sy1, tx0, ty0, tx1, ty1, _recip_refined)
    giou = jnp.sum(mask * (1.0 - giou_d), keepdims=True) * inv_nb * GIOU_COEFF

    # ---- single lane-padded output: lanes 0/1/2 = ce / l1 / giou -----------
    lane = jax.lax.broadcasted_iota(jnp.int32, (1, LANE), 1)
    out_ref[...] = jnp.where(lane == 0, ce,
                             jnp.where(lane == 1, l1,
                                       jnp.where(lane == 2, giou, 0.0)))


# ------------------------------ pallas_call glue -----------------------------
def _full_spec(shape):
    nd = len(shape)
    return pl.BlockSpec(shape, lambda *_: (0,) * nd)


def compute_cost_and_logp(logits, onehot, boxes, tboxT):
    B, N, C = logits.shape
    Tp = onehot.shape[-1]
    return pl.pallas_call(
        cost_kernel,
        out_shape=(jax.ShapeDtypeStruct((B, N, Tp), jnp.float32),
                   jax.ShapeDtypeStruct((B, N, C), jnp.float32)),
        grid=(B,),
        in_specs=[pl.BlockSpec((None, N, C), lambda b: (b, 0, 0)),
                  pl.BlockSpec((None, C, Tp), lambda b: (b, 0, 0)),
                  pl.BlockSpec((None, N, 4), lambda b: (b, 0, 0)),
                  pl.BlockSpec((None, 4, Tp), lambda b: (b, 0, 0))],
        out_specs=(pl.BlockSpec((None, N, Tp), lambda b: (b, 0, 0)),
                   pl.BlockSpec((None, N, C), lambda b: (b, 0, 0))),
        compiler_params=pltpu.CompilerParams(
            dimension_semantics=("parallel",)),
    )(logits, onehot, boxes, tboxT)


def compute_losses(logp_flat, tgt_cls, ce_w, pack):
    M, C = logp_flat.shape
    Kp = pack.shape[1]
    return pl.pallas_call(
        loss_kernel,
        out_shape=jax.ShapeDtypeStruct((1, LANE), jnp.float32),
        grid=(1,),
        in_specs=[_full_spec((M, C)), _full_spec((M, 1)), _full_spec((1, C)),
                  _full_spec((16, Kp))],
        out_specs=_full_spec((1, LANE)),
    )(logp_flat, tgt_cls, ce_w, pack)


# ------------------------- host-side matcher (glue) --------------------------
# TODO(synk): scipy.optimize.linear_sum_assignment has no Pallas equivalent
# (data-dependent sequential algorithm); exact brute-force on host instead
# (assumes T_b <= N, fine at these sizes only).
def _linear_sum_assignment(cost):
    cost = np.asarray(cost)
    n_rows, n_cols = cost.shape
    best_rows, best_cost = (), math.inf
    for rows in itertools.permutations(range(n_rows), n_cols):
        c = float(sum(cost[r, j] for j, r in enumerate(rows)))
        if c < best_cost:
            best_cost, best_rows = c, rows
    row_ind = np.asarray(best_rows, dtype=np.int64)
    col_ind = np.arange(n_cols, dtype=np.int64)
    order = np.argsort(row_ind)
    return row_ind[order], col_ind[order]


def _pad_to_lane(n):
    return LANE * max(1, int(np.ceil(n / LANE)))


def set_criterion_forward(pred_logits, pred_boxes, targets, num_classes,
                          non_object_index=0, non_object_coeff=0.1):
    B, N, C = pred_logits.shape
    M = B * N

    # Host copies of the (tiny) predictions; single D2H here, reused for the
    # matched-box gather so no later device sync is needed for it.
    logits_np = np.asarray(pred_logits, np.float32)
    boxes_np = np.asarray(pred_boxes, np.float32)

    # ----- HungarianMatcher: per-batch cost blocks (Pallas) ------------------
    sizes = [len(t['labels']) for t in targets]
    Tp = _pad_to_lane(max(sizes) if sizes else 1)          # lane-dense target dim

    onehot_np = np.zeros((B, C, Tp), np.float32)
    tboxT_np = np.full((B, 4, Tp), 0.5, np.float32)        # valid dummy boxes
    for b in range(B):
        Tb = sizes[b]
        if Tb:
            ids = np.asarray(targets[b]['labels'], np.int64)
            bx = np.asarray(targets[b]['boxes'], np.float32)
            onehot_np[b, ids, np.arange(Tb)] = 1.0         # col gather == matmul
            tboxT_np[b, :, :Tb] = bx.T

    logits_dev = jnp.asarray(logits_np)
    boxes_dev = jnp.asarray(boxes_np)
    cost, logp = compute_cost_and_logp(
        logits_dev, jnp.asarray(onehot_np, dtype=jnp.bfloat16),
        boxes_dev, jnp.asarray(tboxT_np))
    cost_host = np.asarray(jax.device_get(cost))           # one D2H, (B, N, Tp)

    indices = [_linear_sum_assignment(cost_host[b, :, :sizes[b]])
               for b in range(B)]

    # ----- permutation / gather glue (host; arrays are tiny) -----------------
    batch_idx = np.concatenate([np.full(len(src), b, np.int64)
                                for b, (src, _) in enumerate(indices)])
    src_idx = np.concatenate([src for src, _ in indices])
    tgt_label = np.concatenate(
        [np.asarray(targets[b]['labels'], np.int64)[tgt]
         for b, (_, tgt) in enumerate(indices)]) if len(batch_idx) else \
        np.zeros((0,), np.int64)
    tgt_boxes_matched = np.concatenate(
        [np.asarray(targets[b]['boxes'], np.float32).reshape(-1, 4)[tgt]
         for b, (_, tgt) in enumerate(indices)]).reshape(-1, 4)

    tgt_classes = np.full((B, N), non_object_index, np.int32)
    if len(batch_idx):
        tgt_classes[batch_idx, src_idx] = tgt_label.astype(np.int32)
    src_boxes = boxes_np[batch_idx, src_idx]
    obj_mask = (tgt_label != non_object_index).astype(np.float32)

    # coordinate-major packed box data: rows 0-3 src, 4-7 tgt, 8 mask
    K = src_boxes.shape[0]
    Kp = _pad_to_lane(K)
    pack = np.zeros((16, Kp), np.float32)
    pack[0:8, :] = 0.5                                     # finite GIoU padding
    if K:
        pack[0:4, :K] = src_boxes.T
        pack[4:8, :K] = tgt_boxes_matched.T
        pack[8, :K] = obj_mask

    ce_weight = np.ones((1, C), np.float32)                # register_buffer equiv
    ce_weight[0, non_object_index] = non_object_coeff

    out = compute_losses(
        logp.reshape(M, C),                                # stays on device
        jnp.asarray(tgt_classes.reshape(M, 1)),
        jnp.asarray(ce_weight),
        jnp.asarray(pack),
    )
    return {'l1_loss': out[0, 1], 'giou_loss': out[0, 2], 'ce_loss': out[0, 0]}


# ----------------------------------- main ------------------------------------
if __name__ == "__main__":
    key = jax.random.PRNGKey(0)
    B, N, num_classes = 2, 8, 4
    C = num_classes + 1
    k1, k2, k3, k4 = jax.random.split(key, 4)

    pred_logits = jax.random.normal(k1, (B, N, C), jnp.float32)
    pred_boxes = jax.nn.sigmoid(jax.random.normal(k2, (B, N, 4), jnp.float32))

    n_obj = [3, 2]
    lkeys = jax.random.split(k3, B)
    bkeys = jax.random.split(k4, B)
    targets = []
    for b in range(B):
        labels = np.asarray(
            jax.random.randint(lkeys[b], (n_obj[b],), 1, num_classes + 1),
            np.int64)
        cxcy = np.asarray(jax.random.uniform(bkeys[b], (n_obj[b], 2),
                                             minval=0.2, maxval=0.8))
        wh = np.asarray(jax.random.uniform(jax.random.fold_in(bkeys[b], 1),
                                           (n_obj[b], 2),
                                           minval=0.05, maxval=0.3))
        boxes = np.concatenate([cxcy, wh], axis=1).astype(np.float32)
        targets.append({'labels': labels, 'boxes': boxes})

    losses = set_criterion_forward(pred_logits, pred_boxes, targets, num_classes)
    losses = {k: jax.block_until_ready(v) for k, v in losses.items()}
    for v in losses.values():
        assert np.isfinite(float(v))
    print("KERNEL_OK")
</pallas_src>

<mosaic_0001>
module attributes {stable_mosaic.version = 11 : i64} {
  func.func @cost_kernel(%arg0: i32, %arg1: memref<1x8x5xf32, #tpu.memory_space<vmem>>, %arg2: memref<1x5x128xbf16, #tpu.memory_space<vmem>>, %arg3: memref<1x8x4xf32, #tpu.memory_space<vmem>>, %arg4: memref<1x4x128xf32, #tpu.memory_space<vmem>>, %arg5: memref<1x8x128xf32, #tpu.memory_space<vmem>>, %arg6: memref<1x8x5xf32, #tpu.memory_space<vmem>>) attributes {dimension_semantics = [#tpu.dimension_semantics<parallel>], iteration_bounds = array<i64: 2>, scalar_prefetch = 0 : i64, scratch_operands = 0 : i64, tpu.core_type = #tpu.core_type<tc>, window_params = [{transform_indices = @transform_0, window_bounds = array<i64: 1, 8, 5>}, {transform_indices = @transform_1, window_bounds = array<i64: 1, 5, 128>}, {transform_indices = @transform_2, window_bounds = array<i64: 1, 8, 4>}, {transform_indices = @transform_3, window_bounds = array<i64: 1, 4, 128>}, {transform_indices = @transform_4, window_bounds = array<i64: 1, 8, 128>}, {transform_indices = @transform_5, window_bounds = array<i64: 1, 8, 5>}]} {
    %c0 = arith.constant 0 : index
    %c0_0 = arith.constant 0 : index
    %c0_1 = arith.constant 0 : index
    %0 = vector.load %arg1[%c0, %c0_0, %c0_1] : memref<1x8x5xf32, #tpu.memory_space<vmem>>, vector<1x8x5xf32>
    %1 = vector.shape_cast %0 : vector<1x8x5xf32> to vector<8x5xf32>
    %cst = arith.constant dense<0xFF800000> : vector<8xf32>
    %2 = vector.multi_reduction <maximumf>, %1, %cst [1] : vector<8x5xf32> to vector<8xf32>
    %3 = vector.shape_cast %2 : vector<8xf32> to vector<8x1xf32>
    %4 = vector.broadcast %3 : vector<8x1xf32> to vector<8x5xf32>
    %5 = arith.subf %1, %4 : vector<8x5xf32>
    %6 = math.exp %5 : vector<8x5xf32>
    %cst_2 = arith.constant dense<0.000000e+00> : vector<8xf32>
    %7 = vector.multi_reduction <add>, %6, %cst_2 [1] : vector<8x5xf32> to vector<8xf32>
    %8 = vector.shape_cast %7 : vector<8xf32> to vector<8x1xf32>
    %9 = vector.broadcast %3 : vector<8x1xf32> to vector<8x5xf32>
    %10 = arith.subf %1, %9 : vector<8x5xf32>
    %11 = math.log %8 : vector<8x1xf32>
    %12 = vector.broadcast %11 : vector<8x1xf32> to vector<8x5xf32>
    %13 = arith.subf %10, %12 : vector<8x5xf32>
    %c0_3 = arith.constant 0 : index
    %c0_4 = arith.constant 0 : index
    %c0_5 = arith.constant 0 : index
    %14 = vector.load %arg6[%c0_3, %c0_4, %c0_5] : memref<1x8x5xf32, #tpu.memory_space<vmem>>, vector<1x8x5xf32>
    %15 = vector.shape_cast %14 : vector<1x8x5xf32> to vector<8x5xf32>
    %16 = vector.shape_cast %13 : vector<8x5xf32> to vector<1x8x5xf32>
    tpu.vector_store %arg6[%c0_3, %c0_4, %c0_5], %16 {strides = array<i32>} : memref<1x8x5xf32, #tpu.memory_space<vmem>>, vector<1x8x5xf32>,
    %17 = tpu.reciprocal %8 {approx = true} : vector<8x1xf32> -> vector<8x1xf32>
    %18 = vector.broadcast %17 : vector<8x1xf32> to vector<8x5xf32>
    %19 = arith.mulf %6, %18 : vector<8x5xf32>
    %20 = arith.truncf %19 : vector<8x5xf32> to vector<8x5xbf16>
    %c0_6 = arith.constant 0 : index
    %c0_7 = arith.constant 0 : index
    %c0_8 = arith.constant 0 : index
    %21 = vector.load %arg2[%c0_6, %c0_7, %c0_8] : memref<1x5x128xbf16, #tpu.memory_space<vmem>>, vector<1x5x128xbf16>
    %22 = vector.shape_cast %21 : vector<1x5x128xbf16> to vector<5x128xbf16>
    %cst_9 = arith.constant dense<0.000000e+00> : vector<8x128xf32>
    %23 = tpu.matmul %20, %22, %cst_9 {dimension_numbers = #tpu.dot_dimension_numbers<[1], [0], [0], [1], [0, 0, 1, 1], [], []>} : vector<8x5xbf16>, vector<5x128xbf16>, vector<8x128xf32> -> vector<8x128xf32>
    %cst_10 = arith.constant 0.000000e+00 : f32
    %24 = vector.broadcast %cst_10 : f32 to vector<8x128xf32>
    %25 = arith.subf %24, %23 : vector<8x128xf32>
    %c0_11 = arith.constant 0 : index
    %c0_12 = arith.constant 0 : index
    %c0_13 = arith.constant 0 : index
    %26 = vector.load %arg3[%c0_11, %c0_12, %c0_13] : memref<1x8x4xf32, #tpu.memory_space<vmem>>, vector<1x8x4xf32>
    %27 = vector.shape_cast %26 : vector<1x8x4xf32> to vector<8x4xf32>
    %c0_14 = arith.constant 0 : index
    %c0_15 = arith.constant 0 : index
    %c0_16 = arith.constant 0 : index
    %28 = vector.load %arg4[%c0_14, %c0_15, %c0_16] : memref<1x4x128xf32, #tpu.memory_space<vmem>>, vector<1x4x128xf32>
    %29 = vector.shape_cast %28 : vector<1x4x128xf32> to vector<4x128xf32>
    %30 = vector.extract_strided_slice %27 {offsets = [0, 0], sizes = [8, 1], strides = [1, 1]} : vector<8x4xf32> to vector<8x1xf32>
    %31 = vector.extract_strided_slice %27 {offsets = [0, 1], sizes = [8, 1], strides = [1, 1]} : vector<8x4xf32> to vector<8x1xf32>
    %32 = vector.extract_strided_slice %27 {offsets = [0, 2], sizes = [8, 1], strides = [1, 1]} : vector<8x4xf32> to vector<8x1xf32>
    %33 = vector.extract_strided_slice %27 {offsets = [0, 3], sizes = [8, 1], strides = [1, 1]} : vector<8x4xf32> to vector<8x1xf32>
    %34 = vector.extract_strided_slice %29 {offsets = [0, 0], sizes = [1, 128], strides = [1, 1]} : vector<4x128xf32> to vector<1x128xf32>
    %35 = vector.extract_strided_slice %29 {offsets = [1, 0], sizes = [1, 128], strides = [1, 1]} : vector<4x128xf32> to vector<1x128xf32>
    %36 = vector.extract_strided_slice %29 {offsets = [2, 0], sizes = [1, 128], strides = [1, 1]} : vector<4x128xf32> to vector<1x128xf32>
    %37 = vector.extract_strided_slice %29 {offsets = [3, 0], sizes = [1, 128], strides = [1, 1]} : vector<4x128xf32> to vector<1x128xf32>
    %cst_17 = arith.constant 5.000000e-01 : f32
    %38 = vector.broadcast %cst_17 : f32 to vector<8x1xf32>
    %39 = arith.mulf %38, %32 : vector<8x1xf32>
    %40 = arith.subf %30, %39 : vector<8x1xf32>
    %cst_18 = arith.constant 5.000000e-01 : f32
    %41 = vector.broadcast %cst_18 : f32 to vector<8x1xf32>
    %42 = arith.mulf %41, %33 : vector<8x1xf32>
    %43 = arith.subf %31, %42 : vector<8x1xf32>
    %cst_19 = arith.constant 5.000000e-01 : f32
    %44 = vector.broadcast %cst_19 : f32 to vector<8x1xf32>
    %45 = arith.mulf %44, %32 : vector<8x1xf32>
    %46 = arith.addf %30, %45 : vector<8x1xf32>
    %cst_20 = arith.constant 5.000000e-01 : f32
    %47 = vector.broadcast %cst_20 : f32 to vector<8x1xf32>
    %48 = arith.mulf %47, %33 : vector<8x1xf32>
    %49 = arith.addf %31, %48 : vector<8x1xf32>
    %cst_21 = arith.constant 5.000000e-01 : f32
    %50 = vector.broadcast %cst_21 : f32 to vector<1x128xf32>
    %51 = arith.mulf %50, %36 : vector<1x128xf32>
    %52 = arith.subf %34, %51 : vector<1x128xf32>
    %cst_22 = arith.constant 5.000000e-01 : f32
    %53 = vector.broadcast %cst_22 : f32 to vector<1x128xf32>
    %54 = arith.mulf %53, %37 : vector<1x128xf32>
    %55 = arith.subf %35, %54 : vector<1x128xf32>
    %cst_23 = arith.constant 5.000000e-01 : f32
    %56 = vector.broadcast %cst_23 : f32 to vector<1x128xf32>
    %57 = arith.mulf %56, %36 : vector<1x128xf32>
    %58 = arith.addf %34, %57 : vector<1x128xf32>
    %cst_24 = arith.constant 5.000000e-01 : f32
    %59 = vector.broadcast %cst_24 : f32 to vector<1x128xf32>
    %60 = arith.mulf %59, %37 : vector<1x128xf32>
    %61 = arith.addf %35, %60 : vector<1x128xf32>
    %62 = vector.broadcast %40 : vector<8x1xf32> to vector<8x128xf32>
    %63 = vector.broadcast %52 : vector<1x128xf32> to vector<8x128xf32>
    %64 = arith.maximumf %62, %63 : vector<8x128xf32>
    %65 = vector.broadcast %43 : vector<8x1xf32> to vector<8x128xf32>
    %66 = vector.broadcast %55 : vector<1x128xf32> to vector<8x128xf32>
    %67 = arith.maximumf %65, %66 : vector<8x128xf32>
    %68 = vector.broadcast %46 : vector<8x1xf32> to vector<8x128xf32>
    %69 = vector.broadcast %58 : vector<1x128xf32> to vector<8x128xf32>
    %70 = arith.minimumf %68, %69 : vector<8x128xf32>
    %71 = vector.broadcast %49 : vector<8x1xf32> to vector<8x128xf32>
    %72 = vector.broadcast %61 : vector<1x128xf32> to vector<8x128xf32>
    %73 = arith.minimumf %71, %72 : vector<8x128xf32>
    %74 = arith.subf %70, %64 : vector<8x128xf32>
    %cst_25 = arith.constant 0.000000e+00 : f32
    %75 = vector.broadcast %cst_25 : f32 to vector<8x128xf32>
    %76 = arith.maximumf %74, %75 : vector<8x128xf32>
    %77 = arith.subf %73, %67 : vector<8x128xf32>
    %cst_26 = arith.constant 0.000000e+00 : f32
    %78 = vector.broadcast %cst_26 : f32 to vector<8x128xf32>
    %79 = arith.maximumf %77, %78 : vector<8x128xf32>
    %80 = arith.mulf %76, %79 : vector<8x128xf32>
    %81 = arith.subf %46, %40 : vector<8x1xf32>
    %82 = arith.subf %49, %43 : vector<8x1xf32>
    %83 = arith.mulf %81, %82 : vector<8x1xf32>
    %84 = arith.subf %58, %52 : vector<1x128xf32>
    %85 = arith.subf %61, %55 : vector<1x128xf32>
    %86 = arith.mulf %84, %85 : vector<1x128xf32>
    %87 = vector.broadcast %83 : vector<8x1xf32> to vector<8x128xf32>
    %88 = vector.broadcast %86 : vector<1x128xf32> to vector<8x128xf32>
    %89 = arith.addf %87, %88 : vector<8x128xf32>
    %90 = arith.subf %89, %80 : vector<8x128xf32>
    %cst_27 = arith.constant 1.000000e-07 : f32
    %91 = vector.broadcast %cst_27 : f32 to vector<8x128xf32>
    %92 = arith.addf %90, %91 : vector<8x128xf32>
    %93 = tpu.reciprocal %92 {approx = true} : vector<8x128xf32> -> vector<8x128xf32>
    %94 = arith.mulf %80, %93 : vector<8x128xf32>
    %95 = vector.broadcast %40 : vector<8x1xf32> to vector<8x128xf32>
    %96 = vector.broadcast %52 : vector<1x128xf32> to vector<8x128xf32>
    %97 = arith.minimumf %95, %96 : vector<8x128xf32>
    %98 = vector.broadcast %43 : vector<8x1xf32> to vector<8x128xf32>
    %99 = vector.broadcast %55 : vector<1x128xf32> to vector<8x128xf32>
    %100 = arith.minimumf %98, %99 : vector<8x128xf32>
    %101 = vector.broadcast %46 : vector<8x1xf32> to vector<8x128xf32>
    %102 = vector.broadcast %58 : vector<1x128xf32> to vector<8x128xf32>
    %103 = arith.maximumf %101, %102 : vector<8x128xf32>
    %104 = vector.broadcast %49 : vector<8x1xf32> to vector<8x128xf32>
    %105 = vector.broadcast %61 : vector<1x128xf32> to vector<8x128xf32>
    %106 = arith.maximumf %104, %105 : vector<8x128xf32>
    %107 = arith.subf %103, %97 : vector<8x128xf32>
    %108 = arith.subf %106, %100 : vector<8x128xf32>
    %109 = arith.mulf %107, %108 : vector<8x128xf32>
    %110 = arith.subf %109, %90 : vector<8x128xf32>
    %cst_28 = arith.constant 1.000000e-07 : f32
    %111 = vector.broadcast %cst_28 : f32 to vector<8x128xf32>
    %112 = arith.addf %109, %111 : vector<8x128xf32>
    %113 = tpu.reciprocal %112 {approx = true} : vector<8x128xf32> -> vector<8x128xf32>
    %114 = arith.mulf %110, %113 : vector<8x128xf32>
    %115 = arith.subf %94, %114 : vector<8x128xf32>
    %cst_29 = arith.constant 0.000000e+00 : f32
    %116 = vector.broadcast %cst_29 : f32 to vector<8x128xf32>
    %117 = arith.subf %116, %115 : vector<8x128xf32>
    %118 = vector.broadcast %30 : vector<8x1xf32> to vector<8x128xf32>
    %119 = vector.broadcast %34 : vector<1x128xf32> to vector<8x128xf32>
    %120 = arith.subf %118, %119 : vector<8x128xf32>
    %121 = math.absf %120 : vector<8x128xf32>
    %122 = vector.broadcast %31 : vector<8x1xf32> to vector<8x128xf32>
    %123 = vector.broadcast %35 : vector<1x128xf32> to vector<8x128xf32>
    %124 = arith.subf %122, %123 : vector<8x128xf32>
    %125 = math.absf %124 : vector<8x128xf32>
    %126 = arith.addf %121, %125 : vector<8x128xf32>
    %127 = vector.broadcast %32 : vector<8x1xf32> to vector<8x128xf32>
    %128 = vector.broadcast %36 : vector<1x128xf32> to vector<8x128xf32>
    %129 = arith.subf %127, %128 : vector<8x128xf32>
    %130 = math.absf %129 : vector<8x128xf32>
    %131 = arith.addf %126, %130 : vector<8x128xf32>
    %132 = vector.broadcast %33 : vector<8x1xf32> to vector<8x128xf32>
    %133 = vector.broadcast %37 : vector<1x128xf32> to vector<8x128xf32>
    %134 = arith.subf %132, %133 : vector<8x128xf32>
    %135 = math.absf %134 : vector<8x128xf32>
    %136 = arith.addf %131, %135 : vector<8x128xf32>
    %137 = arith.addf %25, %117 : vector<8x128xf32>
    %138 = arith.addf %137, %136 : vector<8x128xf32>
    %c0_30 = arith.constant 0 : index
    %c0_31 = arith.constant 0 : index
    %c0_32 = arith.constant 0 : index
    %139 = vector.load %arg5[%c0_30, %c0_31, %c0_32] : memref<1x8x128xf32, #tpu.memory_space<vmem>>, vector<1x8x128xf32>
    %140 = vector.shape_cast %139 : vector<1x8x128xf32> to vector<8x128xf32>
    %141 = vector.shape_cast %138 : vector<8x128xf32> to vector<1x8x128xf32>
    tpu.vector_store %arg5[%c0_30, %c0_31, %c0_32], %141 {strides = array<i32>} : memref<1x8x128xf32, #tpu.memory_space<vmem>>, vector<1x8x128xf32>,
    return
  }
  func.func @transform_0(%arg0: i32) -> (i32, i32, i32) {
    %c0_i32 = arith.constant 0 : i32
    %c0_i32_0 = arith.constant 0 : i32
    %c0_i32_1 = arith.constant 0 : i32
    return %arg0, %c0_i32, %c0_i32_0 : i32, i32, i32
  }
  func.func @transform_1(%arg0: i32) -> (i32, i32, i32) {
    %c0_i32 = arith.constant 0 : i32
    %c0_i32_0 = arith.constant 0 : i32
    %c0_i32_1 = arith.constant 0 : i32
    return %arg0, %c0_i32, %c0_i32_0 : i32, i32, i32
  }
  func.func @transform_2(%arg0: i32) -> (i32, i32, i32) {
    %c0_i32 = arith.constant 0 : i32
    %c0_i32_0 = arith.constant 0 : i32
    %c0_i32_1 = arith.constant 0 : i32
    return %arg0, %c0_i32, %c0_i32_0 : i32, i32, i32
  }
  func.func @transform_3(%arg0: i32) -> (i32, i32, i32) {
    %c0_i32 = arith.constant 0 : i32
    %c0_i32_0 = arith.constant 0 : i32
    %c0_i32_1 = arith.constant 0 : i32
    return %arg0, %c0_i32, %c0_i32_0 : i32, i32, i32
  }
  func.func @transform_4(%arg0: i32) -> (i32, i32, i32) {
    %c0_i32 = arith.constant 0 : i32
    %c0_i32_0 = arith.constant 0 : i32
    %c0_i32_1 = arith.constant 0 : i32
    return %arg0, %c0_i32, %c0_i32_0 : i32, i32, i32
  }
  func.func @transform_5(%arg0: i32) -> (i32, i32, i32) {
    %c0_i32 = arith.constant 0 : i32
    %c0_i32_0 = arith.constant 0 : i32
    %c0_i32_1 = arith.constant 0 : i32
    return %arg0, %c0_i32, %c0_i32_0 : i32, i32, i32
  }
}

</mosaic_0001>

<bundles_post_ra>
// kernel: tpu_custom_call.1
= control target key start
LH: loop header
LB: loop body
LE: loop exit
PB: predicated region body
PF: predicated region fallthrough
CT: control target
= control target key end

     0   :  { %11 = vsyncpa [#allocation3], 0  ;;  %s889_s0 = inlined_call_operand.vmem [shape: f32[2,8,5], index: 0, kind: input, shape index: {}]   ;;  %s890_s1 = inlined_call_operand.vmem [shape: bf16[2,5,128], index: 1, kind: input, shape index: {}]   ;;  %s891_s2 = inlined_call_operand.vmem [shape: f32[2,8,4], index: 2, kind: input, shape index: {}]   ;;  %s892_s3 = inlined_call_operand.vmem [shape: f32[2,4,128], index: 3, kind: input, shape index: {}]   ;;  %s893_s4 = inlined_call_operand.hbm [shape: f32[2,8,128], index: 4, kind: output, shape index: {0}]   ;;  %s894_s5 = inlined_call_operand.vmem [shape: f32[2,8,5], index: 5, kind: output, shape index: {1}]  }
   0x1   :  { %13 = vsyncpa [#allocation3 + $0x1], 0  ;;  %s766_s18 = smov 0   ;;  %s768_s19 = smov 0  }
   0x2   :  { %s770_s20 = smov 0   ;;  %s772_s21 = smov 0  }
   0x3 LB: > { %s787_s22 = sadd.s32 4294967295, %s727_s21   ;;  %s584_s23 = sadd.s32 4294967294, %s727_s21   ;;  %s727_s21 = sphi %s772_s21, %s900_s21   ;;  %s723_s20 = sphi %s770_s20, %s899_s20   ;;  %s719_s19 = sphi %s768_s19, %s898_s19   ;;  %s715_s18 = sphi %s766_s18, %s897_s18  }
   0x4   : > { %s791_s24 = sadd.s32 1, %s727_s21   ;;  %s130_s25 = sadd.s32 1, %s723_s20 }
   0x5   : > { %s127_s26 = ssub.s32 %s727_s21, %s791_s24  ;;  %p140_p0 = scmp.ne.s32.totalorder %s723_s20, %s719_s19 }
   0x6   : > { %p128_p1 = scmp.eq.s32.totalorder %s127_s26, 0  ;;  %p141_p2 = scmp.eq.s32.totalorder %s787_s22, 1 }
   0x7   : > { %p146_p3 = scmp.ne.s32.totalorder %s719_s19, %s715_s18  ;;  %p147_p4 = scmp.eq.s32.totalorder %s584_s23, 1 }
   0x8   : > { %s802_s27 = scalar_select %p128_p1, %s723_s20, %s130_s25  }
   0x9   : > { %p804_p5 = por %p141_p2, %p140_p0  ;;  %p808_p6 = por %p147_p4, %p146_p3 }
   0xa   : > { %p587_p7 = scmp.ge.s32.totalorder %s727_s21, 1  ;;  %p219_p8 = scmp.lt.s32.totalorder %s727_s21, 3 }
   0xc   : > { %p220_p9 = pnand %p587_p7, %p219_p8 }
   0xd   : > { %p262_p10 = scmp.lt.s32.totalorder (!%p220_p9), %s787_s22, 1  ;;  %s729_s13 = smov (!%p220_p9), 126  }
   0xe   : > { %223 = sbr.rel (%p220_p9) target bundleno = 417 (0x1a1), region = 36  ;;  %s732_s14 = smov (!%p220_p9), 127  }
   0xf   : > { %s596_s11 = sshll.u32 (!%p220_p9), %s787_s22, 3  ;;  %s685_s8 = scalar_lea.hbm (!%p220_p9), %s893_s4, 16 }
  0x13   : > { %s816_s30 = scalar_select %p262_p10, %s787_s22, 1  ;;  %vm284_vm0 = vcmask 39936   ;;  %v730_v4 = vmov 1   ;;  %v731_v5 = vmov 0   ;;  %vm305_vm1 = vcmask 1041408  }
  0x14   : > { %648 = vset.pattern.permute.xlu1 %v730_v4  ;;  %645 = vset.pattern.permute.xlu2 %v731_v5  ;;  %vm306_vm2 = vcmask 1042432   ;;  %v733_v15 = vmov 65535   ;;  %v734_v20 = vmov 2   ;;  %v735_v23 = vmov 3  }
  0x15   : > { %s819_s6 = sshll.u32 %s816_s30, 3  ;;  %647 = vset.pattern.permute.xlu0 %v731_v5  ;;  %s590_s15 = sshll.u32 %s816_s30, 2  ;;  %v307_v16 = vsel %vm305_vm1, 4294967295, %v733_v15 }
  0x16   : > { %s265_s9 = scalar_lea.vmem %s889_s0, %s819_s6  ;;  %s273_s12 = scalar_lea.vmem %s891_s2, %s819_s6  ;;  %v308_v18 = vsel %vm306_vm2, %v307_v16, 0 }
  0x17   : > { %v283_v0 = vld [vmem:[%s265_s9] sm:$0xff]  ;;  %s269_s23 = scalar_lea.vmem %s890_s1, %s590_s15  ;;  %s281_s7 = scalar_lea.vmem %s894_s5, %s819_s6 }
  0x18   : > { %v829_v1 = vld [vmem:[%s273_s12] sm:$0xff]  ;;  %v285_v2 = vsel %vm284_vm0, %v283_v0, -inf  ;;  %s277_s10 = scalar_lea.vmem %s892_s3, %s590_s15  ;;  %s253_s30 = sand.u32 1, %s719_s19  }
  0x19   : > { %v328_v3 = vmul.f32 0.5, %v829_v1  ;;  %286 = vmax.xlane.f32.xlu0 %v285_v2  ;;  %v301_v17 = vld [vmem:[%s269_s23] sm:$0x7]  ;;  %s588_s6 = sshll.u32 %s253_s30, 3  ;;  %s443_s22 = scalar_lea.sflag [#allocation3], %s253_s30 }
  0x1a   : > { %v310_v19 = vand.u32 %v308_v18, %v301_v17  ;;  %v327_v31 = vld [vmem:[%s277_s10] sm:$0xf]  ;;  %s255_s15 = scalar_lea.vmem [#allocation2], %s588_s6 }
  0x1b   : > { %330 = vrot.lane.b32.xlu1 %v328_v3, %s729_s13  ;;  %v335_v32 = vmul.f32 0.5, %v327_v31  ;;  %s459_s16 = sshll.u32 %s255_s15, 4  ;;  %s460_s16 = int_to_ptr.vmem [resolvable:$true] %s459_s16 }
  0x1c   : > { %319 = vmatpush.bf16.msra.mxu0 %v310_v19 }
  0x1d   : > { %v337_v33 = vrot.slane %v335_v32, 2 }
  0x1f   : > { %v339_v35 = vsub.f32 %v327_v31, %v337_v33  ;;  %v340_v36 = vadd.f32 %v337_v33, %v327_v31 }
  0x21   : > { %v378_v37 = vsub.f32 %v340_v36, %v339_v35  ;;  %v359_v38 = vperm.slane %v340_v36, 0  ;;  %v346_v40 = vperm.slane %v339_v35, 0  ;;  %v352_v41 = vperm.slane %v339_v35, 1 }
  0x22   : > { %v365_v42 = vperm.slane %v340_v36, 1 }
  0x23   : > { %v380_v43 = vrot.slane %v378_v37, 1 }
  0x25   : > { %v382_v50 = vmul.f32 %v380_v43, %v378_v37 }
  0x27   : > { %v388_v53 = vperm.slane %v382_v50, 0 }
  0x8c   : > { %v287_v7 = vpop.xlane.xlu0 %286 }
  0x8d   : > { %v331_v6 = vpop.permute.xlu1 %330  ;;  %v288_v10 = vsub.f32 %v283_v0, %v287_v7  ;;  %v419_v7 = vperm.slane %v327_v31, 1 }
  0x8e   : > { %v333_v8 = vsub.f32 %v829_v1, %v331_v6  ;;  %v334_v9 = vadd.f32 %v331_v6, %v829_v1  ;;  %v412_v6 = vperm.slane %v327_v31, 0 }
  0x8f   : > { %v289_v11 = vmul.f32 1.442695, %v288_v10 }
  0x90   : > { %v372_v12 = vsub.f32 %v334_v9, %v333_v8  ;;  %343 = vperm.xlu2 %645, %v333_v8  }
  0x91   : > { %655 = vpow2.f32 %v289_v11  ;;  %v427_v11 = vperm.slane %v327_v31, 2 }
  0x92   : > { %374 = vrot.lane.b32.xlu1 %v372_v12, %s732_s14  ;;  %s457_s14 = scalar_lea.hbm %s893_s4, %s596_s11 }
  0x93   : > { %s461_s17 = sshll.u32 %s457_s14, 4  ;;  %s462_s17 = int_to_ptr.hbm [resolvable:$true] %s461_s17 }
  0x94   : > { %s679_s23 = sshra.s32 %s462_s17, 4  ;;  %s680_s23 = int_to_ptr.hbm [resolvable:$true] %s679_s23 }
  0x95   : > { %s681_s25 = scalar_lea.hbm %s680_s23, 8  ;;  %p686_p0 = scmp.lt.s32.totalorder %s680_s23, %s893_s4 }
  0x96   : > { %p682_p11 = scmp.ne.s32.totalorder %s680_s23, %s681_s25  ;;  %p687_p1 = scmp.lt.s32.totalorder %s685_s8, %s681_s25 }
  0x97   : > { %v656_v13 = vpop.eup %655 }
  0x98   : > { %646 = vset.pattern.permute.xlu2 %v730_v4  ;;  %v291_v14 = vsel %vm284_vm0, %v656_v13, 0.0  ;;  %p683_p12 = pnand %p682_p11, %p804_p5  ;;  %p688_p2 = por %p687_p1, %p686_p0 }
  0x99   : > { %349 = vperm.xlu2 %646, %v333_v8   ;;  %292 = vadd.xlane.f32.xlu0 %v291_v14  ;;  %v435_v14 = vperm.slane %v327_v31, 3 }
  0x9a   : > { %362 = vperm.xlu1 %648, %v334_v9   ;;  %p684_p13 = pneg %p683_p12 }
  0x9c   : > { %p689_p3 = pnand %p688_p2, %p684_p13 }
  0xa1   : > { %650 = vset.pattern.permute.xlu2 %v731_v5 }
  0xa2   : > { %649 = vset.pattern.permute.xlu1 %v731_v5 }
  0xa3   : > { %409 = vperm.xlu1 %649, %v829_v1  }
  0xab   : > { %652 = vset.pattern.permute.xlu1 %v734_v20 }
  0xac   : > { %424 = vperm.xlu1 %652, %v829_v1  }
  0xad   : > { %356 = vperm.xlu0 %647, %v334_v9  }
  0xb5   : > { %654 = vset.pattern.permute.xlu0 %v735_v23 }
  0xea   : > { %v344_v34 = vpop.permute.xlu2 %343 }
  0xeb   : > { %v347_v47 = vmax.f32 %v344_v34, %v346_v40  ;;  %v394_v59 = vmin.f32 %v344_v34, %v346_v40 }
  0xf3   : > { %v350_v44 = vpop.permute.xlu2 %349 }
  0xf4   : > { %v353_v48 = vmax.f32 %v350_v44, %v352_v41  ;;  %v395_v60 = vmin.f32 %v350_v44, %v352_v41 }
 0x104   : > { %v375_v21 = vpop.permute.xlu1 %374 }
 0x105   : > { %v377_v22 = vmul.f32 %v375_v21, %v372_v12 }
 0x107   : > { %385 = vperm.xlu2 %650, %v377_v22  }
 0x10c   : > { %v293_v24 = vpop.xlane.xlu0 %292  ;;  %v363_v45 = vpop.permute.xlu1 %362 }
 0x10d   : > { %657 = vlog2.f32 %v293_v24  ;;  %v366_v49 = vmin.f32 %v363_v45, %v365_v42  ;;  %v397_v61 = vmax.f32 %v363_v45, %v365_v42 }
 0x10e   : > { %659 = vrcp.f32 %v293_v24 }
 0x10f   : > { %651 = vset.pattern.permute.xlu2 %v730_v4  ;;  %v369_v52 = vsub.f32 %v366_v49, %v353_v48 }
 0x110   : > { %416 = vperm.xlu2 %651, %v829_v1  }
 0x111   : > { %v370_v56 = vmax.f32 %v369_v52, 0.0 }
 0x113   : > { %v658_v25 = vpop.eup %657 }
 0x114   : > { %v660_v26 = vpop.eup %659  ;;  %v295_v27 = vmul.f32 0.6931472, %v658_v25 }
 0x115   : > { %v299_v28 = vmul.f32 %v660_v26, %v656_v13  ;;  %v410_v2 = vpop.permute.xlu1 %409 }
 0x116   : > { %v296_v29 = vsub.f32 %v288_v10, %v295_v27  ;;  %v413_v9 = vsub.f32 %v410_v2, %v412_v6 }
 0x117   : > { %v300_v30 = vpack.c.bf16 %v299_v28, %v299_v28 }
 0x118   : > { %653 = vset.pattern.permute.xlu2 %v735_v23  ;;  %297 = vst.msk [vmem:[%s281_s7] sm:$0xff] %vm284_vm0, %v296_v29  ;;  %v414_v16 = vand.u32 2147483647, %v413_v9 }
 0x119   : > { %432 = vperm.xlu2 %653, %v829_v1   ;;  %594 = vmatmul.msk.bf16.vlgmr.msra.gmra.mxu0 %vm284_vm0, %v300_v30  ;;  %v399_v1 = vsub.f32 %v397_v61, %v395_v60 }
 0x11e   : > { %v425_v12 = vpop.permute.xlu1 %424 }
 0x11f   : > { %v357_v39 = vpop.permute.xlu0 %356  ;;  %v428_v18 = vsub.f32 %v425_v12, %v427_v11 }
 0x120   : > { %v360_v46 = vmin.f32 %v357_v39, %v359_v38  ;;  %v396_v57 = vmax.f32 %v357_v39, %v359_v38 }
 0x121   : > { %v429_v24 = vand.u32 2147483647, %v428_v18 }
 0x122   : > { %v367_v51 = vsub.f32 %v360_v46, %v347_v47  ;;  %v398_v63 = vsub.f32 %v396_v57, %v394_v59 }
 0x124   : > { %v368_v55 = vmax.f32 %v367_v51, 0.0  ;;  %v400_v3 = vmul.f32 %v399_v1, %v398_v63 }
 0x126   : > { %v371_v62 = vmul.f32 %v370_v56, %v368_v55  ;;  %v402_v8 = vadd.f32 1e-07, %v400_v3 }
 0x161   : > { %v386_v54 = vpop.permute.xlu2 %385 }
 0x162   : > { %v389_v58 = vadd.f32 %v388_v53, %v386_v54 }
 0x164   : > { %v390_v0 = vsub.f32 %v389_v58, %v371_v62 }
 0x166   : > { %v391_v4 = vadd.f32 1e-07, %v390_v0  ;;  %v401_v15 = vsub.f32 %v400_v3, %v390_v0 }
 0x168   : > { %661 = vrcp.f32 %v391_v4 }
 0x169   : > { %663 = vrcp.f32 %v402_v8 }
 0x16a   : > { %v417_v5 = vpop.permute.xlu2 %416 }
 0x16b   : > { %v420_v10 = vsub.f32 %v417_v5, %v419_v7 }
 0x16d   : > { %v421_v17 = vand.u32 2147483647, %v420_v10 }
 0x16e   : > { %v662_v13 = vpop.eup %661 }
 0x16f   : > { %v393_v20 = vmul.f32 %v662_v13, %v371_v62  ;;  %v664_v21 = vpop.eup %663  ;;  %v422_v23 = vadd.f32 %v421_v17, %v414_v16 }
 0x170   : > { %v404_v22 = vmul.f32 %v664_v21, %v401_v15 }
 0x171   : > { %v430_v27 = vadd.f32 %v429_v24, %v422_v23 }
 0x172   : > { %v405_v26 = vsub.f32 %v393_v20, %v404_v22 }
 0x173   : > { %v433_v19 = vpop.permute.xlu2 %432 }
 0x174   : > { %v436_v25 = vsub.f32 %v433_v19, %v435_v14  ;;  %v406_v31 = vsub.f32 0.0, %v405_v26 }
 0x176   : > { %v437_v28 = vand.u32 2147483647, %v436_v25 }
 0x178   : > { %v438_v32 = vadd.f32 %v437_v28, %v430_v27 }
 0x196   : > { %v321_v29 = vpop.f32.mrf.mxu0 }
 0x197   : > { %v325_v30 = vsub.f32 0.0, %v321_v29 }
 0x199   : > { %v439_v33 = vadd.f32 %v406_v31, %v325_v30 }
 0x19b   : > { %v440_v34 = vadd.f32 %v439_v33, %v438_v32 }
 0x19d   : > { %441 = vst [vmem:[%s255_s15] sm:$0xff] %v440_v34 }
 0x19e   : > { %v323_v35 = vpop.f32.mrf.mxu0 }
 0x19f   : > { %692 = shalt.err (!%p689_p3)
}
 0x1a0   : > { %599 = dma.vmem_to_hbm [thread:$0]  (%p804_p5), %s460_s16, 128, %s462_s17, %s443_s22  }
 0x1a1 PF: > { %p605_p4 = scmp.ge.s32.totalorder %s727_s21, 2  ;;  %s476_s30 = sand.u32 1, %s715_s18  }
 0x1a2   : > { %s477_s6 = scalar_lea.sflag [#allocation3], %s476_s30 }
 0x1a3   : > { %p602_p7 = pnand %p605_p4, %p808_p6 }
 0x1a5   : > { %p603_p8 = pneg %p602_p7 }
 0x1a7   : > { %710 = dma.done.wait (%p603_p8), %s477_s6, 128  }
 0x1a8   : > { %712 = vsyncadd (%p603_p8), %s477_s6, 4294967168  ;;  %p16_p9 = scmp.ge.s32.totalorder %s791_s24, 4   ;;  %s897_s18 = smov %s719_s19 }
 0x1a9   : > { %s898_s19 = smov %s723_s20  ;;  %s899_s20 = smov %s802_s27 }
 0x1aa   : > { %s900_s21 = smov %s791_s24  ;;  %18 = sbr.rel (!%p16_p9) target bundleno = 3 (0x3), region = 92 }
 0x1af   :  { %490 = vsyncpa [#allocation3], 1 }
 0x1b0   :  { %492 = vsyncpa [#allocation3 + $0x1], 1 }

</bundles_post_ra>
